<compile_context>
chip_gen: v5e
topology: v5e:2x2
jax: 0.10.0
libtpu: 0.0.40
codegen_flags: <defaults>
</compile_context>

<pallas_src>
import functools

import jax
import jax.numpy as jnp
from jax.experimental import pallas as pl
from jax.experimental.pallas import tpu as pltpu

_LANE = 128      # lane width (last dim)
_SUBLANE = 8     # sublane width (second-to-last dim)
_MAX_ROW_TILE = 256


def _round_up(x, m):
    return (x + m - 1) // m * m


def _fused_mlp_kernel(*refs, num_layers):
    """One grid step: a (tm, 128k) batch tile pushed through all layers in VMEM.

    refs = (x_ref, w0, b0, w1, b1, ..., w_{L-1}, b_{L-1}, y_ref, h_ref)
    """
    x_ref = refs[0]
    wb_refs = refs[1:1 + 2 * num_layers]
    y_ref = refs[1 + 2 * num_layers]
    h_ref = refs[2 + 2 * num_layers]

    h = x_ref[...]
    # input_fc + hidden layers, each followed by ReLU.
    for i in range(num_layers - 1):
        w = wb_refs[2 * i][...]
        b = wb_refs[2 * i + 1][...]          # (1, N) — broadcast over rows
        h = jnp.maximum(
            jnp.dot(h, w, preferred_element_type=jnp.float32) + b, 0.0)
    # h_hidden: state prior to the output layer.
    h_ref[...] = h.astype(h_ref.dtype)

    # output_fc (no activation).
    w = wb_refs[-2][...]
    b = wb_refs[-1][...]
    y = jnp.dot(h, w, preferred_element_type=jnp.float32) + b
    y_ref[...] = y.astype(y_ref.dtype)


def _mlp_forward_impl(params, x):
    """Mirrors MLP.forward: returns (y_pred, h_hidden)."""
    batch = x.shape[0]
    x = x.reshape(batch, -1)                 # x.view(batch_size, -1)
    input_dim = x.shape[1]

    num_layers = len(params)
    hidden_dim = params[0][0].shape[1]
    output_dim = params[-1][0].shape[1]

    # ---- lane-dense padded dims (host-side glue, done once under jit) ----
    in_p = _round_up(input_dim, _LANE)
    hid_p = _round_up(hidden_dim, _LANE)
    out_p = _round_up(output_dim, _LANE)

    # Batch row tile: whole (sublane-padded) batch if small, else 256-row
    # tiles streamed over a parallel grid.
    m_pad = _round_up(batch, _SUBLANE)
    tm = min(m_pad, _MAX_ROW_TILE)
    m_pad = _round_up(m_pad, tm)
    grid = (m_pad // tm,)

    x_p = jnp.zeros((m_pad, in_p), x.dtype).at[:batch, :input_dim].set(x)

    dims_in = [in_p] + [hid_p] * (num_layers - 1)
    dims_out = [hid_p] * (num_layers - 1) + [out_p]

    padded_wb = []
    for (w, b), dpi, dpo in zip(params, dims_in, dims_out):
        k, n = w.shape
        w_p = jnp.zeros((dpi, dpo), w.dtype).at[:k, :n].set(w)
        b_p = jnp.zeros((1, dpo), b.dtype).at[0, :n].set(b)
        padded_wb.extend([w_p, b_p])

    # BlockSpecs: activations stream per row-tile; weights/biases are resident
    # (same (0, 0) block every grid step — tiny, stay pinned in VMEM).
    in_specs = [pl.BlockSpec((tm, in_p), lambda i: (i, 0))]
    for dpi, dpo in zip(dims_in, dims_out):
        in_specs.append(pl.BlockSpec((dpi, dpo), lambda i: (0, 0)))
        in_specs.append(pl.BlockSpec((1, dpo), lambda i: (0, 0)))

    kernel = functools.partial(_fused_mlp_kernel, num_layers=num_layers)
    y_p, h_p = pl.pallas_call(
        kernel,
        grid=grid,
        out_shape=(
            jax.ShapeDtypeStruct((m_pad, out_p), x.dtype),
            jax.ShapeDtypeStruct((m_pad, hid_p), x.dtype),
        ),
        in_specs=in_specs,
        out_specs=(
            pl.BlockSpec((tm, out_p), lambda i: (i, 0)),
            pl.BlockSpec((tm, hid_p), lambda i: (i, 0)),
        ),
        compiler_params=pltpu.CompilerParams(
            dimension_semantics=("parallel",),   # batch tiles shard across TCs (v7x)
        ),
    )(x_p, *padded_wb)

    # Slice away lane / batch padding in the wrapper.
    y_pred = y_p[:batch, :output_dim]
    h_hidden = h_p[:batch, :hidden_dim]
    return y_pred, h_hidden


# Single jitted launch for the whole forward (removes eager dispatch overhead).
mlp_forward = jax.jit(_mlp_forward_impl)


def init_mlp_params(key, input_dim, output_dim, neurons_per_layer, num_hidden_layers):
    """Deterministic PyTorch-Linear-style init (uniform(-1/sqrt(fan_in), +))."""
    dims = [input_dim] + [neurons_per_layer] * num_hidden_layers + [output_dim]
    params = []
    for i in range(len(dims) - 1):
        fan_in, fan_out = dims[i], dims[i + 1]
        key, kw, kb = jax.random.split(key, 3)
        bound = 1.0 / jnp.sqrt(jnp.asarray(fan_in, jnp.float32))
        # Stored directly in (in_features, out_features) layout for the kernel.
        w = jax.random.uniform(kw, (fan_in, fan_out), jnp.float32, -bound, bound)
        b = jax.random.uniform(kb, (fan_out,), jnp.float32, -bound, bound)
        params.append((w, b))
    return params


if __name__ == "__main__":
    # Shapes implied by the module docstring: input_dim=13, output_dim=5.
    batch = 8
    input_dim = 13
    output_dim = 5
    neurons_per_layer = 32
    num_hidden_layers = 2  # -> one hidden Linear beyond input_fc

    key = jax.random.PRNGKey(0)
    key, kx = jax.random.split(key)
    x = jax.random.normal(kx, (batch, input_dim), jnp.float32)

    params = init_mlp_params(
        key, input_dim, output_dim, neurons_per_layer, num_hidden_layers
    )

    y_pred, h_hidden = mlp_forward(params, x)
    jax.block_until_ready(y_pred)
    jax.block_until_ready(h_hidden)

    # Pure-JAX reference check.
    def ref_forward(params, x):
        h = x.reshape(x.shape[0], -1)
        h = jnp.maximum(h @ params[0][0] + params[0][1], 0.0)
        for w, b in params[1:-1]:
            h = jnp.maximum(h @ w + b, 0.0)
        return h @ params[-1][0] + params[-1][1], h

    y_ref, h_ref = ref_forward(params, x)
    assert y_pred.shape == (batch, output_dim), y_pred.shape
    assert h_hidden.shape == (batch, neurons_per_layer), h_hidden.shape
    assert jnp.allclose(y_pred, y_ref, atol=1e-5), "y_pred mismatch"
    assert jnp.allclose(h_hidden, h_ref, atol=1e-5), "h_hidden mismatch"

    # TODO(synk): for very large batches, a bf16-input / f32-accumulate variant
    # would better feed the v6e/v7x MXU; kept f32 here to match nn.Linear exactly.

    print("KERNEL_OK")
</pallas_src>

<mosaic_0001>
module attributes {stable_mosaic.version = 11 : i64} {
  func.func @_fused_mlp_kernel(%arg0: i32, %arg1: memref<8x128xf32, #tpu.memory_space<vmem>>, %arg2: memref<128x128xf32, #tpu.memory_space<vmem>>, %arg3: memref<1x128xf32, #tpu.memory_space<vmem>>, %arg4: memref<128x128xf32, #tpu.memory_space<vmem>>, %arg5: memref<1x128xf32, #tpu.memory_space<vmem>>, %arg6: memref<128x128xf32, #tpu.memory_space<vmem>>, %arg7: memref<1x128xf32, #tpu.memory_space<vmem>>, %arg8: memref<8x128xf32, #tpu.memory_space<vmem>>, %arg9: memref<8x128xf32, #tpu.memory_space<vmem>>) attributes {dimension_semantics = [#tpu.dimension_semantics<parallel>], iteration_bounds = array<i64: 1>, scalar_prefetch = 0 : i64, scratch_operands = 0 : i64, tpu.core_type = #tpu.core_type<tc>, window_params = [{transform_indices = @transform_0, window_bounds = array<i64: 8, 128>}, {pipeline_mode = #tpu.pipeline_mode<synchronous>, transform_indices = @transform_1, window_bounds = array<i64: 128, 128>}, {pipeline_mode = #tpu.pipeline_mode<synchronous>, transform_indices = @transform_2, window_bounds = array<i64: 1, 128>}, {pipeline_mode = #tpu.pipeline_mode<synchronous>, transform_indices = @transform_3, window_bounds = array<i64: 128, 128>}, {pipeline_mode = #tpu.pipeline_mode<synchronous>, transform_indices = @transform_4, window_bounds = array<i64: 1, 128>}, {pipeline_mode = #tpu.pipeline_mode<synchronous>, transform_indices = @transform_5, window_bounds = array<i64: 128, 128>}, {pipeline_mode = #tpu.pipeline_mode<synchronous>, transform_indices = @transform_6, window_bounds = array<i64: 1, 128>}, {transform_indices = @transform_7, window_bounds = array<i64: 8, 128>}, {transform_indices = @transform_8, window_bounds = array<i64: 8, 128>}]} {
    %c0 = arith.constant 0 : index
    %c0_0 = arith.constant 0 : index
    %0 = vector.load %arg1[%c0, %c0_0] : memref<8x128xf32, #tpu.memory_space<vmem>>, vector<8x128xf32>
    %c0_1 = arith.constant 0 : index
    %c0_2 = arith.constant 0 : index
    %1 = vector.load %arg2[%c0_1, %c0_2] : memref<128x128xf32, #tpu.memory_space<vmem>>, vector<128x128xf32>
    %c0_3 = arith.constant 0 : index
    %c0_4 = arith.constant 0 : index
    %2 = vector.load %arg3[%c0_3, %c0_4] : memref<1x128xf32, #tpu.memory_space<vmem>>, vector<1x128xf32>
    %cst = arith.constant dense<0.000000e+00> : vector<8x128xf32>
    %3 = tpu.matmul %0, %1, %cst {dimension_numbers = #tpu.dot_dimension_numbers<[1], [0], [0], [1], [0, 0, 1, 1], [], []>} : vector<8x128xf32>, vector<128x128xf32>, vector<8x128xf32> -> vector<8x128xf32>
    %4 = vector.broadcast %2 : vector<1x128xf32> to vector<8x128xf32>
    %5 = arith.addf %3, %4 : vector<8x128xf32>
    %cst_5 = arith.constant 0.000000e+00 : f32
    %6 = vector.broadcast %cst_5 : f32 to vector<8x128xf32>
    %7 = arith.maximumf %5, %6 : vector<8x128xf32>
    %c0_6 = arith.constant 0 : index
    %c0_7 = arith.constant 0 : index
    %8 = vector.load %arg4[%c0_6, %c0_7] : memref<128x128xf32, #tpu.memory_space<vmem>>, vector<128x128xf32>
    %c0_8 = arith.constant 0 : index
    %c0_9 = arith.constant 0 : index
    %9 = vector.load %arg5[%c0_8, %c0_9] : memref<1x128xf32, #tpu.memory_space<vmem>>, vector<1x128xf32>
    %cst_10 = arith.constant dense<0.000000e+00> : vector<8x128xf32>
    %10 = tpu.matmul %7, %8, %cst_10 {dimension_numbers = #tpu.dot_dimension_numbers<[1], [0], [0], [1], [0, 0, 1, 1], [], []>} : vector<8x128xf32>, vector<128x128xf32>, vector<8x128xf32> -> vector<8x128xf32>
    %11 = vector.broadcast %9 : vector<1x128xf32> to vector<8x128xf32>
    %12 = arith.addf %10, %11 : vector<8x128xf32>
    %cst_11 = arith.constant 0.000000e+00 : f32
    %13 = vector.broadcast %cst_11 : f32 to vector<8x128xf32>
    %14 = arith.maximumf %12, %13 : vector<8x128xf32>
    %c0_12 = arith.constant 0 : index
    %c0_13 = arith.constant 0 : index
    %15 = vector.load %arg9[%c0_12, %c0_13] : memref<8x128xf32, #tpu.memory_space<vmem>>, vector<8x128xf32>
    tpu.vector_store %arg9[%c0_12, %c0_13], %14 {strides = array<i32>} : memref<8x128xf32, #tpu.memory_space<vmem>>, vector<8x128xf32>,
    %c0_14 = arith.constant 0 : index
    %c0_15 = arith.constant 0 : index
    %16 = vector.load %arg6[%c0_14, %c0_15] : memref<128x128xf32, #tpu.memory_space<vmem>>, vector<128x128xf32>
    %c0_16 = arith.constant 0 : index
    %c0_17 = arith.constant 0 : index
    %17 = vector.load %arg7[%c0_16, %c0_17] : memref<1x128xf32, #tpu.memory_space<vmem>>, vector<1x128xf32>
    %cst_18 = arith.constant dense<0.000000e+00> : vector<8x128xf32>
    %18 = tpu.matmul %14, %16, %cst_18 {dimension_numbers = #tpu.dot_dimension_numbers<[1], [0], [0], [1], [0, 0, 1, 1], [], []>} : vector<8x128xf32>, vector<128x128xf32>, vector<8x128xf32> -> vector<8x128xf32>
    %19 = vector.broadcast %17 : vector<1x128xf32> to vector<8x128xf32>
    %20 = arith.addf %18, %19 : vector<8x128xf32>
    %c0_19 = arith.constant 0 : index
    %c0_20 = arith.constant 0 : index
    %21 = vector.load %arg8[%c0_19, %c0_20] : memref<8x128xf32, #tpu.memory_space<vmem>>, vector<8x128xf32>
    tpu.vector_store %arg8[%c0_19, %c0_20], %20 {strides = array<i32>} : memref<8x128xf32, #tpu.memory_space<vmem>>, vector<8x128xf32>,
    return
  }
  func.func @transform_0(%arg0: i32) -> (i32, i32) {
    %c0_i32 = arith.constant 0 : i32
    %c0_i32_0 = arith.constant 0 : i32
    return %arg0, %c0_i32 : i32, i32
  }
  func.func @transform_1(%arg0: i32) -> (i32, i32) {
    %c0_i32 = arith.constant 0 : i32
    %c0_i32_0 = arith.constant 0 : i32
    %c0_i32_1 = arith.constant 0 : i32
    return %c0_i32, %c0_i32_0 : i32, i32
  }
  func.func @transform_2(%arg0: i32) -> (i32, i32) {
    %c0_i32 = arith.constant 0 : i32
    %c0_i32_0 = arith.constant 0 : i32
    %c0_i32_1 = arith.constant 0 : i32
    return %c0_i32, %c0_i32_0 : i32, i32
  }
  func.func @transform_3(%arg0: i32) -> (i32, i32) {
    %c0_i32 = arith.constant 0 : i32
    %c0_i32_0 = arith.constant 0 : i32
    %c0_i32_1 = arith.constant 0 : i32
    return %c0_i32, %c0_i32_0 : i32, i32
  }
  func.func @transform_4(%arg0: i32) -> (i32, i32) {
    %c0_i32 = arith.constant 0 : i32
    %c0_i32_0 = arith.constant 0 : i32
    %c0_i32_1 = arith.constant 0 : i32
    return %c0_i32, %c0_i32_0 : i32, i32
  }
  func.func @transform_5(%arg0: i32) -> (i32, i32) {
    %c0_i32 = arith.constant 0 : i32
    %c0_i32_0 = arith.constant 0 : i32
    %c0_i32_1 = arith.constant 0 : i32
    return %c0_i32, %c0_i32_0 : i32, i32
  }
  func.func @transform_6(%arg0: i32) -> (i32, i32) {
    %c0_i32 = arith.constant 0 : i32
    %c0_i32_0 = arith.constant 0 : i32
    %c0_i32_1 = arith.constant 0 : i32
    return %c0_i32, %c0_i32_0 : i32, i32
  }
  func.func @transform_7(%arg0: i32) -> (i32, i32) {
    %c0_i32 = arith.constant 0 : i32
    %c0_i32_0 = arith.constant 0 : i32
    return %arg0, %c0_i32 : i32, i32
  }
  func.func @transform_8(%arg0: i32) -> (i32, i32) {
    %c0_i32 = arith.constant 0 : i32
    %c0_i32_0 = arith.constant 0 : i32
    return %arg0, %c0_i32 : i32, i32
  }
}

</mosaic_0001>

<bundles_post_ra>
// kernel: _mlp_forward_impl.1
= control target key start
LH: loop header
LB: loop body
LE: loop exit
PB: predicated region body
PF: predicated region fallthrough
CT: control target
= control target key end

     0   :  { %14 = vsyncpa [#allocation3], 0  ;;  %s453_s0 = inlined_call_operand.vmem [shape: f32[8,128], index: 0, kind: input, shape index: {}]   ;;  %s454_s1 = inlined_call_operand.vmem [shape: f32[128,128], index: 1, kind: input, shape index: {}]   ;;  %s455_s2 = inlined_call_operand.vmem [shape: f32[1,128], index: 2, kind: input, shape index: {}]   ;;  %s456_s3 = inlined_call_operand.vmem [shape: f32[128,128], index: 3, kind: input, shape index: {}]   ;;  %s457_s4 = inlined_call_operand.vmem [shape: f32[1,128], index: 4, kind: input, shape index: {}]   ;;  %s458_s5 = inlined_call_operand.vmem [shape: f32[128,128], index: 5, kind: input, shape index: {}]   ;;  %s459_s6 = inlined_call_operand.vmem [shape: f32[1,128], index: 6, kind: input, shape index: {}]   ;;  %s460_s7 = inlined_call_operand.hbm [shape: f32[8,128], index: 7, kind: output, shape index: {0}]   ;;  %s461_s8 = inlined_call_operand.hbm [shape: f32[8,128], index: 8, kind: output, shape index: {1}]  }
   0x1   :  { %v46_v0 = vld [vmem:[%s454_s1 + $0x78] sm:$0xff]  ;;  %v45_v1 = vld [vmem:[%s454_s1 + $0x70] sm:$0xff]  ;;  %v44_v2 = vld [vmem:[%s454_s1 + $0x68] sm:$0xff] }
   0x2   :  { %51 = vmatpush.msra.mxu0 %v46_v0  ;;  %v43_v3 = vld [vmem:[%s454_s1 + $0x60] sm:$0xff]  ;;  %v87_v4 = vld [vmem:[%s456_s3 + $0x78] sm:$0xff]  ;;  %v86_v6 = vld [vmem:[%s456_s3 + $0x70] sm:$0xff] }
   0x3   :  { %v42_v5 = vld [vmem:[%s454_s1 + $0x58] sm:$0xff]  ;;  %92 = vmatpush.msra.mxu1 %v87_v4  ;;  %v85_v7 = vld [vmem:[%s456_s3 + $0x68] sm:$0xff]  ;;  %v41_v8 = vld [vmem:[%s454_s1 + $0x50] sm:$0xff] }
   0x4   :  { %52 = vmatpush.msra.mxu0 %v45_v1  ;;  %v84_v9 = vld [vmem:[%s456_s3 + $0x60] sm:$0xff]  ;;  %v40_v10 = vld [vmem:[%s454_s1 + $0x48] sm:$0xff]  ;;  %v83_v11 = vld [vmem:[%s456_s3 + $0x58] sm:$0xff] }
   0x5   :  { %93 = vmatpush.msra.mxu1 %v86_v6 }
   0x6   :  { %53 = vmatpush.msra.mxu0 %v44_v2 }
   0x7   :  { %94 = vmatpush.msra.mxu1 %v85_v7 }
   0x8   :  { %54 = vmatpush.msra.mxu0 %v43_v3 }
   0xa   :  { %55 = vmatpush.msra.mxu0 %v42_v5 }
   0xc   :  { %56 = vmatpush.msra.mxu0 %v41_v8 }
   0xd   :  { %15 = vsyncpa [#allocation5], 0  ;;  %v39_v12 = vld [vmem:[%s454_s1 + $0x40] sm:$0xff]  ;;  %95 = vmatpush.msra.mxu1 %v84_v9  ;;  %v82_v13 = vld [vmem:[%s456_s3 + $0x50] sm:$0xff]  ;;  %s244_s12 = smov [#allocation4]   ;;  %s173_s16 = sshll.u32 %s461_s8, 4  ;;  %s174_s16 = int_to_ptr.hbm [resolvable:$true] %s173_s16 }
   0xe   :  { %57 = vmatpush.msra.mxu0 %v40_v10  ;;  %v38_v14 = vld [vmem:[%s454_s1 + $0x38] sm:$0xff]  ;;  %v81_v15 = vld [vmem:[%s456_s3 + $0x48] sm:$0xff]  ;;  %v37_v16 = vld [vmem:[%s454_s1 + $0x30] sm:$0xff]  ;;  %s171_s13 = sshll.u32 %s244_s12, 4  ;;  %s245_s18 = smov [#allocation2]   ;;  %s172_s13 = int_to_ptr.vmem [resolvable:$true] %s171_s13 }
   0xf   :  { %96 = vmatpush.msra.mxu1 %v83_v11  ;;  %v80_v17 = vld [vmem:[%s456_s3 + $0x40] sm:$0xff]  ;;  %v36_v18 = vld [vmem:[%s454_s1 + $0x28] sm:$0xff]  ;;  %v79_v19 = vld [vmem:[%s456_s3 + $0x38] sm:$0xff]  ;;  %s162_s21 = sshll.u32 %s460_s7, 4  ;;  %s163_s21 = int_to_ptr.hbm [resolvable:$true] %s162_s21 }
  0x10   :  { %58 = vmatpush.msra.mxu0 %v39_v12  ;;  %v35_v20 = vld [vmem:[%s454_s1 + $0x20] sm:$0xff]  ;;  %v78_v21 = vld [vmem:[%s456_s3 + $0x30] sm:$0xff]  ;;  %v34_v22 = vld [vmem:[%s454_s1 + $0x18] sm:$0xff] }
  0x11   :  { %97 = vmatpush.msra.mxu1 %v82_v13  ;;  %v77_v23 = vld [vmem:[%s456_s3 + $0x28] sm:$0xff]  ;;  %v33_v24 = vld [vmem:[%s454_s1 + $0x10] sm:$0xff]  ;;  %v76_v25 = vld [vmem:[%s456_s3 + $0x20] sm:$0xff] }
  0x12   :  { %59 = vmatpush.msra.mxu0 %v38_v14  ;;  %v32_v26 = vld [vmem:[%s454_s1 + $0x8] sm:$0xff]  ;;  %v75_v27 = vld [vmem:[%s456_s3 + $0x18] sm:$0xff]  ;;  %v31_v28 = vld [vmem:[%s454_s1] sm:$0xff] }
  0x13   :  { %98 = vmatpush.msra.mxu1 %v81_v15  ;;  %v30_v29 = vld [vmem:[%s453_s0] sm:$0xff]  ;;  %v74_v30 = vld [vmem:[%s456_s3 + $0x10] sm:$0xff]  ;;  %v73_v31 = vld [vmem:[%s456_s3 + $0x8] sm:$0xff] }
  0x14   :  { %60 = vmatpush.msra.mxu0 %v37_v16  ;;  %v72_v32 = vld [vmem:[%s456_s3] sm:$0xff]  ;;  %v129_v33 = vld [vmem:[%s458_s5 + $0x78] sm:$0xff]  ;;  %v128_v34 = vld [vmem:[%s458_s5 + $0x70] sm:$0xff] }
  0x15   :  { %99 = vmatpush.msra.mxu1 %v80_v17  ;;  %134 = vmatpush.msra.mxu2 %v129_v33  ;;  %v127_v35 = vld [vmem:[%s458_s5 + $0x68] sm:$0xff]  ;;  %v126_v36 = vld [vmem:[%s458_s5 + $0x60] sm:$0xff]  ;;  %v125_v37 = vld [vmem:[%s458_s5 + $0x58] sm:$0xff] }
  0x16   :  { %61 = vmatpush.msra.mxu0 %v36_v18  ;;  %v124_v38 = vld [vmem:[%s458_s5 + $0x50] sm:$0xff]  ;;  %v123_v39 = vld [vmem:[%s458_s5 + $0x48] sm:$0xff]  ;;  %v122_v40 = vld [vmem:[%s458_s5 + $0x40] sm:$0xff] }
  0x17   :  { %100 = vmatpush.msra.mxu1 %v79_v19  ;;  %135 = vmatpush.msra.mxu2 %v128_v34  ;;  %v121_v41 = vld [vmem:[%s458_s5 + $0x38] sm:$0xff]  ;;  %v120_v42 = vld [vmem:[%s458_s5 + $0x30] sm:$0xff]  ;;  %v119_v43 = vld [vmem:[%s458_s5 + $0x28] sm:$0xff] }
  0x18   :  { %62 = vmatpush.msra.mxu0 %v35_v20  ;;  %v118_v44 = vld [vmem:[%s458_s5 + $0x20] sm:$0xff]  ;;  %v117_v45 = vld [vmem:[%s458_s5 + $0x18] sm:$0xff]  ;;  %v116_v50 = vld [vmem:[%s458_s5 + $0x10] sm:$0xff] }
  0x19   :  { %101 = vmatpush.msra.mxu1 %v78_v21  ;;  %136 = vmatpush.msra.mxu2 %v127_v35  ;;  %v189_v46 = vld [vmem:[%s455_s2] ss:$0 sm:$0xff]  ;;  %v115_v51 = vld [vmem:[%s458_s5 + $0x8] sm:$0xff] }
  0x1a   :  { %63 = vmatpush.msra.mxu0 %v34_v22  ;;  %v114_v52 = vld [vmem:[%s458_s5] sm:$0xff] }
  0x1b   :  { %102 = vmatpush.msra.mxu1 %v77_v23  ;;  %137 = vmatpush.msra.mxu2 %v126_v36  ;;  %v190_v53 = vld [vmem:[%s457_s4] ss:$0 sm:$0xff]  ;;  %s160_s4 = sshll.u32 %s245_s18, 4  ;;  %s161_s4 = int_to_ptr.vmem [resolvable:$true] %s160_s4 }
  0x1c   :  { %64 = vmatpush.msra.mxu0 %v33_v24  ;;  %v191_v57 = vld [vmem:[%s459_s6] ss:$0 sm:$0xff] }
  0x1d   :  { %103 = vmatpush.msra.mxu1 %v76_v25  ;;  %138 = vmatpush.msra.mxu2 %v125_v37 }
  0x1e   :  { %65 = vmatpush.msra.mxu0 %v32_v26 }
  0x1f   :  { %104 = vmatpush.msra.mxu1 %v75_v27  ;;  %139 = vmatpush.msra.mxu2 %v124_v38 }
  0x20   :  { %66 = vmatpush.msra.mxu0 %v31_v28 }
  0x21   :  { %67 = vmatmul.f32.vlgmr.msra.gmra.mxu0 %v30_v29  ;;  %105 = vmatpush.msra.mxu1 %v74_v30 }
  0x22   :  { %140 = vmatpush.msra.mxu2 %v123_v39 }
  0x23   :  { %106 = vmatpush.msra.mxu1 %v73_v31 }
  0x24   :  { %141 = vmatpush.msra.mxu2 %v122_v40 }
  0x25   :  { %107 = vmatpush.msra.mxu1 %v72_v32 }
  0x26   :  { %142 = vmatpush.msra.mxu2 %v121_v41 }
  0x28   :  { %143 = vmatpush.msra.mxu2 %v120_v42 }
  0x2a   :  { %144 = vmatpush.msra.mxu2 %v119_v43 }
  0x2c   :  { %145 = vmatpush.msra.mxu2 %v118_v44 }
  0x2e   :  { %146 = vmatpush.msra.mxu2 %v117_v45 }
  0x30   :  { %147 = vmatpush.msra.mxu2 %v116_v50 }
  0x32   :  { %148 = vmatpush.msra.mxu2 %v115_v51 }
  0x34   :  { %149 = vmatpush.msra.mxu2 %v114_v52 }
  0x9e   :  { %v68_v47 = vpop.f32.mrf.mxu0 }
  0x9f   :  { %v69_v48 = vadd.f32 %v189_v46, %v68_v47 }
  0xa1   :  { %v71_v49 = vmax.f32 %v69_v48, 0.0 }
  0xa3   :  { %108 = vmatmul.f32.vlgmr.msra.gmra.mxu1 %v71_v49 }
 0x120   :  { %v109_v54 = vpop.f32.mrf.mxu1 }
 0x121   :  { %v110_v55 = vadd.f32 %v190_v53, %v109_v54 }
 0x123   :  { %v112_v56 = vmax.f32 %v110_v55, 0.0 }
 0x125   :  { %113 = vst [vmem:[#allocation4] sm:$0xff] %v112_v56  ;;  %150 = vmatmul.f32.vlgmr.msra.gmra.mxu2 %v112_v56 }
 0x126   :  { %176 = dma.vmem_to_hbm [thread:$0]  %s172_s13, 128, %s174_s16, [#allocation5]  }
 0x1a8   :  { %v151_v58 = vpop.f32.mrf.mxu2 }
 0x1a9   :  { %v152_v59 = vadd.f32 %v191_v57, %v151_v58 }
 0x1ab   :  { %154 = vst [vmem:[#allocation2] sm:$0xff] %v152_v59 }
 0x1ac   :  { %165 = dma.vmem_to_hbm [thread:$0]  %s161_s4, 128, %s163_s21, [#allocation3]  }
 0x1ad   :  { %240 = dma.done.wait [#allocation3], 128  }
 0x1ae   :  { %241 = vsyncadd [#allocation3], 4294967168 }
 0x1af   :  { %242 = dma.done.wait [#allocation5], 128  }
 0x1b0   :  { %243 = vsyncadd [#allocation5], 4294967168 }
 0x1b1   :  { %185 = vsyncpa [#allocation3], 1 }
 0x1b2   :  { %186 = vsyncpa [#allocation5], 1 }

</bundles_post_ra>
